<compile_context>
chip_gen: v5e
topology: v5e:2x2
jax: 0.10.0
libtpu: 0.0.40
codegen_flags: <defaults>
</compile_context>

<pallas_src>
import functools
import math

import jax
import jax.numpy as jnp
from jax import lax
from jax.experimental import pallas as pl
from jax.experimental.pallas import tpu as pltpu


# ---------------------------------------------------------------------------
# Kernels
# ---------------------------------------------------------------------------
def _fc_small_kernel(*refs, act, has_bias):
    """Whole-problem-in-VMEM path (no grid): one MXU call + fused epilogue."""
    x_ref, w_ref = refs[0], refs[1]
    b_ref = refs[2] if has_bias else None
    o_ref = refs[2 + int(has_bias)]

    x = x_ref[...]
    if x.dtype != w_ref.dtype:                 # e.g. bf16 weight, f32 activations
        x = x.astype(w_ref.dtype)
    # Torch layout W is (N, K): contract both operands on their LAST axis, so
    # no transposed copy of the weight is ever materialized.
    y = lax.dot_general(x, w_ref[...], (((1,), (1,)), ((), ())),
                        preferred_element_type=jnp.float32)
    if has_bias:
        y = y + b_ref[...]
    if act is not None:
        y = act(y)
    o_ref[...] = y.astype(o_ref.dtype)


def _fc_tiled_kernel(*refs, act, has_bias, use_scratch, x_full_k, tk):
    """Grid = (M tiles, N tiles, K tiles); K (reduction) is innermost."""
    x_ref, w_ref = refs[0], refs[1]
    b_ref = refs[2] if has_bias else None
    o_ref = refs[2 + int(has_bias)]
    # f32 outputs accumulate directly into the resident output block; other
    # output dtypes use a dedicated f32 VMEM scratch accumulator.
    acc_ref = refs[3 + int(has_bias)] if use_scratch else o_ref

    k = pl.program_id(2)

    @pl.when(k == 0)
    def _():
        acc_ref[...] = jnp.zeros_like(acc_ref)

    if x_full_k:
        # x block holds the full K extent (DMA'd once per M tile, VMEM
        # resident across the whole N x K loop); slice the current K tile.
        start = pl.multiple_of(k * tk, tk)
        x_tile = x_ref[:, pl.ds(start, tk)]
    else:
        x_tile = x_ref[...]
    if x_tile.dtype != w_ref.dtype:
        x_tile = x_tile.astype(w_ref.dtype)

    # Weight stays in torch (N, K) layout: contract on the last axis of both.
    acc_ref[...] += lax.dot_general(x_tile, w_ref[...],
                                    (((1,), (1,)), ((), ())),
                                    preferred_element_type=jnp.float32)

    @pl.when(k == pl.num_programs(2) - 1)
    def _():
        y = acc_ref[...]
        if has_bias:                          # bias fused in epilogue only
            y = y + b_ref[...]
        if act is not None:                   # nonlinearity fused in epilogue
            y = act(y)
        o_ref[...] = y.astype(o_ref.dtype)


# ---------------------------------------------------------------------------
# Nonlinearity mapping (matches torch.nn.functional defaults)
# ---------------------------------------------------------------------------
_NONLIN = {
    None: None,
    "relu": jax.nn.relu,
    "tanh": jnp.tanh,
    "sigmoid": jax.nn.sigmoid,
    # torch F.gelu default is the exact erf form -> approximate=False.
    "gelu": functools.partial(jax.nn.gelu, approximate=False),
    "elu": jax.nn.elu,
    "leaky_relu": jax.nn.leaky_relu,
    "softplus": jax.nn.softplus,
}


# ---------------------------------------------------------------------------
# Helpers
# ---------------------------------------------------------------------------
def _pick_tile(dim, target, align=128):
    """Largest tile <= target that is a multiple of `align` AND divides `dim`;
    falls back to the full dim (always layout-legal)."""
    if dim <= target:
        return dim
    t = (target // align) * align
    while t >= align:
        if dim % t == 0:
            return t
        t -= align
    return dim


def _vmem_capacity_bytes():
    try:
        return int(pltpu.get_tpu_info().vmem_capacity_bytes)
    except Exception:
        return 64 << 20          # conservative default (v7x per-core VMEM)


# ---------------------------------------------------------------------------
# Wrapper
# ---------------------------------------------------------------------------
def fc_layer(x, weight, bias=None, nonlinearity=None, *, out_dtype=None,
             force_grid=False, tile_m=None, tile_n=None, tile_k=None):
    """Pallas FCLayer forward.

    x:      (B, input_size)
    weight: (hidden_size, input_size)  -- torch nn.Linear layout, NOT transposed
    bias:   (hidden_size,) or None
    nonlinearity: None or a key of _NONLIN ("relu", "tanh", ...)
    out_dtype: output dtype (default: x.dtype)
    force_grid / tile_*: testing hooks to force the tiled path / tile sizes.
    """
    if nonlinearity not in _NONLIN:
        # TODO(synk): only common F.* nonlinearities are mapped; extend _NONLIN
        # if the model config uses another one.
        raise ValueError(f"unsupported nonlinearity: {nonlinearity!r}")
    act = _NONLIN[nonlinearity]

    batch, k_dim = x.shape
    n_dim, k_dim_w = weight.shape
    assert k_dim_w == k_dim, "weight must be (hidden_size, input_size)"
    has_bias = bias is not None
    out_dtype = jnp.dtype(out_dtype) if out_dtype is not None else x.dtype
    use_scratch = out_dtype != jnp.dtype(jnp.float32)

    xb = x.dtype.itemsize
    wb = weight.dtype.itemsize
    ob = jnp.dtype(out_dtype).itemsize

    cap = _vmem_capacity_bytes()
    budget = int(0.70 * cap)           # tile-selection budget
    vmem_limit = int(0.85 * cap)       # generation-aware scoped VMEM limit

    args = [x, weight]
    if has_bias:
        b2d = jnp.asarray(bias).reshape(1, n_dim).astype(jnp.float32)
        args.append(b2d)

    # ----- small-layer bypass: whole problem fits comfortably in VMEM -------
    total_bytes = (batch * k_dim * xb + n_dim * k_dim * wb
                   + batch * n_dim * ob + (n_dim * 4 if has_bias else 0))
    no_overrides = tile_m is None and tile_n is None and tile_k is None
    if (not force_grid) and no_overrides and total_bytes <= min(budget, 24 << 20):
        kernel = functools.partial(_fc_small_kernel, act=act, has_bias=has_bias)
        return pl.pallas_call(
            kernel,
            out_shape=jax.ShapeDtypeStruct((batch, n_dim), out_dtype),
            compiler_params=pltpu.CompilerParams(vmem_limit_bytes=vmem_limit),
        )(*args)

    # ----- tiled path --------------------------------------------------------
    def est_bytes(tm_, tn_, tk_, full_):
        x_blk = 2 * tm_ * (k_dim if full_ else tk_) * xb      # (double-buffered)
        w_blk = 3 * tn_ * tk_ * wb                            # Buffered(3) worst case
        b_blk = (2 * tn_ * 4) if has_bias else 0
        o_blk = 2 * tm_ * tn_ * ob
        acc = (tm_ * tn_ * 4) if use_scratch else 0
        return x_blk + w_blk + b_blk + o_blk + acc

    if not no_overrides:
        tm = tile_m if tile_m is not None else _pick_tile(batch, 256, align=8)
        tn = tile_n if tile_n is not None else _pick_tile(n_dim, 256)
        tk = tile_k if tile_k is not None else _pick_tile(k_dim, 512)
        assert batch % tm == 0 and n_dim % tn == 0 and k_dim % tk == 0, \
            "tile overrides must divide the problem dims"
        x_full_k = 2 * tm * k_dim * xb <= max(budget // 3, 1 << 20)
    else:
        chosen = None
        for tm_t in (256, 128, 64, 32, 16, 8):
            tm_c = _pick_tile(batch, tm_t, align=8)
            for tn_t, tk_t in ((512, 4096), (512, 2048), (256, 2048),
                               (256, 1024), (256, 512), (128, 512),
                               (128, 256), (128, 128)):
                tn_c = _pick_tile(n_dim, tn_t)
                tk_c = _pick_tile(k_dim, tk_t)
                full_c = 2 * tm_c * k_dim * xb <= budget // 3
                if est_bytes(tm_c, tn_c, tk_c, full_c) <= budget:
                    chosen = (tm_c, tn_c, tk_c, full_c)
                    break
            if chosen is not None:
                break
        if chosen is None:   # last resort: smallest aligned tiles, streamed x
            chosen = (_pick_tile(batch, 8, align=8),
                      _pick_tile(n_dim, 128), _pick_tile(k_dim, 128), False)
        tm, tn, tk, x_full_k = chosen

    nm, nn, nk = batch // tm, n_dim // tn, k_dim // tk
    vmem_limit = min(max(vmem_limit, int(1.25 * est_bytes(tm, tn, tk, x_full_k))),
                     int(0.95 * cap))

    # x: full-K resident (constant across n, k) or K-tiled stream.
    if x_full_k:
        x_spec = pl.BlockSpec((tm, k_dim), lambda m, n, k: (m, 0))
    else:
        x_spec = pl.BlockSpec((tm, tk), lambda m, n, k: (m, k))
    # Weight in torch (N, K) layout; 3-deep buffering keeps the dominant
    # weight DMA stream saturated when there are enough K steps.
    if nk >= 3:
        w_spec = pl.BlockSpec((tn, tk), lambda m, n, k: (n, k),
                              pipeline_mode=pl.Buffered(3))
    else:
        w_spec = pl.BlockSpec((tn, tk), lambda m, n, k: (n, k))
    in_specs = [x_spec, w_spec]
    if has_bias:
        in_specs.append(pl.BlockSpec((1, tn), lambda m, n, k: (0, n)))
    out_spec = pl.BlockSpec((tm, tn), lambda m, n, k: (m, n))
    scratch_shapes = [pltpu.VMEM((tm, tn), jnp.float32)] if use_scratch else []

    kernel = functools.partial(_fc_tiled_kernel, act=act, has_bias=has_bias,
                               use_scratch=use_scratch, x_full_k=x_full_k, tk=tk)

    return pl.pallas_call(
        kernel,
        out_shape=jax.ShapeDtypeStruct((batch, n_dim), out_dtype),
        grid_spec=pltpu.PrefetchScalarGridSpec(
            num_scalar_prefetch=0,
            grid=(nm, nn, nk),
            in_specs=in_specs,
            out_specs=out_spec,
            scratch_shapes=scratch_shapes,
        ),
        compiler_params=pltpu.CompilerParams(
            dimension_semantics=("parallel", "parallel", "arbitrary"),
            vmem_limit_bytes=vmem_limit,
        ),
    )(*args)


# ---------------------------------------------------------------------------
# Deterministic parameter init matching FCLayer.init_hidden()
# ---------------------------------------------------------------------------
def init_fc_params(key, input_size, hidden_size, use_bias=True, dtype=jnp.float32):
    initrange = 1.0 / math.sqrt(input_size * hidden_size)
    w = jax.random.uniform(key, (hidden_size, input_size), jnp.float32,
                           -initrange, initrange).astype(dtype)
    b = jnp.zeros((hidden_size,), jnp.float32) if use_bias else None
    return w, b


# ---------------------------------------------------------------------------
# Demo / self-test
# ---------------------------------------------------------------------------
if __name__ == "__main__":
    key = jax.random.PRNGKey(0)
    k_w1, k_x1, k_w2, k_x2 = jax.random.split(key, 4)

    # 1. Small layer: single-block (grid-less) path, relu + bias.
    B1, K1, N1 = 4, 64, 32
    w1, b1 = init_fc_params(k_w1, K1, N1, use_bias=True)
    x1 = jax.random.normal(k_x1, (B1, K1), jnp.float32)
    y1 = jax.block_until_ready(
        jax.jit(lambda x, w, b: fc_layer(x, w, b, nonlinearity="relu"))(x1, w1, b1))
    ref1 = jnp.maximum(x1 @ w1.T + b1, 0.0)
    assert y1.shape == (B1, N1)
    assert jnp.allclose(y1, ref1, rtol=1e-2, atol=1e-3), "small relu mismatch"

    # 2. Small layer: no bias, no nonlinearity.
    y2 = jax.block_until_ready(
        jax.jit(lambda x, w: fc_layer(x, w, None, None))(x1, w1))
    assert jnp.allclose(y2, x1 @ w1.T, rtol=1e-2, atol=1e-3), "linear mismatch"

    # 3. Tiled path (forced): f32, tanh + bias; exercises the (M, N, K) grid,
    #    resident-x slicing and direct-into-output f32 accumulation.
    B2, K2, N2 = 16, 512, 256
    w2, b2 = init_fc_params(k_w2, K2, N2, use_bias=True)
    x2 = jax.random.normal(k_x2, (B2, K2), jnp.float32)
    tiled = jax.jit(lambda x, w, b: fc_layer(
        x, w, b, nonlinearity="tanh", force_grid=True,
        tile_m=8, tile_n=128, tile_k=128))
    y3 = jax.block_until_ready(tiled(x2, w2, b2))
    ref3 = jnp.tanh(x2 @ w2.T + b2)
    assert jnp.allclose(y3, ref3, rtol=1e-2, atol=1e-3), "tiled tanh mismatch"

    # 4. bf16 weight stream (halved HBM weight bytes), f32 accumulation.
    w2_bf16 = w2.astype(jnp.bfloat16)
    y4 = jax.block_until_ready(jax.jit(lambda x, w, b: fc_layer(
        x, w, b, nonlinearity=None, force_grid=True,
        tile_m=8, tile_n=128, tile_k=128))(x2, w2_bf16, b2))
    ref4 = x2 @ w2_bf16.astype(jnp.float32).T + b2
    assert jnp.allclose(y4, ref4, rtol=2e-2, atol=2e-2), "bf16-weight mismatch"

    # 5. bf16 output (exercises the f32 scratch-accumulator path).
    y5 = jax.block_until_ready(jax.jit(lambda x, w, b: fc_layer(
        x, w, b, nonlinearity=None, out_dtype=jnp.bfloat16, force_grid=True,
        tile_m=8, tile_n=128, tile_k=128))(x2, w2, b2))
    ref5 = x2 @ w2.T + b2
    assert y5.dtype == jnp.bfloat16
    assert jnp.allclose(y5.astype(jnp.float32), ref5, rtol=2e-2, atol=2e-2), \
        "bf16-output mismatch"

    print("KERNEL_OK")
</pallas_src>

<mosaic_0001>
module attributes {stable_mosaic.version = 11 : i64} {
  func.func @_fc_small_kernel(%arg0: memref<4x64xf32, #tpu.memory_space<vmem>>, %arg1: memref<32x64xf32, #tpu.memory_space<vmem>>, %arg2: memref<1x32xf32, #tpu.memory_space<vmem>>, %arg3: memref<4x32xf32, #tpu.memory_space<vmem>>) attributes {dimension_semantics = [], scalar_prefetch = 0 : i64, scratch_operands = 0 : i64, tpu.core_type = #tpu.core_type<tc>} {
    %c0 = arith.constant 0 : index
    %c0_0 = arith.constant 0 : index
    %0 = vector.load %arg0[%c0, %c0_0] : memref<4x64xf32, #tpu.memory_space<vmem>>, vector<4x64xf32>
    %c0_1 = arith.constant 0 : index
    %c0_2 = arith.constant 0 : index
    %1 = vector.load %arg1[%c0_1, %c0_2] : memref<32x64xf32, #tpu.memory_space<vmem>>, vector<32x64xf32>
    %cst = arith.constant dense<0.000000e+00> : vector<4x32xf32>
    %2 = tpu.matmul %0, %1, %cst {dimension_numbers = #tpu.dot_dimension_numbers<[1], [1], [0], [0], [0, 0, 1, 0], [], []>} : vector<4x64xf32>, vector<32x64xf32>, vector<4x32xf32> -> vector<4x32xf32>
    %c0_3 = arith.constant 0 : index
    %c0_4 = arith.constant 0 : index
    %3 = vector.load %arg2[%c0_3, %c0_4] : memref<1x32xf32, #tpu.memory_space<vmem>>, vector<1x32xf32>
    %4 = vector.broadcast %3 : vector<1x32xf32> to vector<4x32xf32>
    %5 = arith.addf %2, %4 : vector<4x32xf32>
    %cst_5 = arith.constant 0.000000e+00 : f32
    %6 = vector.broadcast %cst_5 : f32 to vector<4x32xf32>
    %7 = arith.maximumf %5, %6 : vector<4x32xf32>
    %c0_6 = arith.constant 0 : index
    %c0_7 = arith.constant 0 : index
    %8 = vector.load %arg3[%c0_6, %c0_7] : memref<4x32xf32, #tpu.memory_space<vmem>>, vector<4x32xf32>
    tpu.vector_store %arg3[%c0_6, %c0_7], %7 {strides = array<i32>} : memref<4x32xf32, #tpu.memory_space<vmem>>, vector<4x32xf32>,
    return
  }
}

</mosaic_0001>

<bundles_post_ra>
// kernel: _lambda_.1
= control target key start
LH: loop header
LB: loop body
LE: loop exit
PB: predicated region body
PF: predicated region fallthrough
CT: control target
= control target key end

     0   :  { %8 = vsyncpa [#allocation3], 0  ;;  %s237_s0 = inlined_call_operand.hbm [shape: f32[4,64], index: 0, kind: input, shape index: {}]   ;;  %s238_s1 = inlined_call_operand.hbm [shape: f32[32,64], index: 1, kind: input, shape index: {}]   ;;  %s239_s2 = inlined_call_operand.vmem [shape: f32[1,32], index: 2, kind: input, shape index: {}]   ;;  %s240_s3 = inlined_call_operand.hbm [shape: f32[4,32], index: 3, kind: output, shape index: {}]  }
   0x1   :  { %9 = vsyncpa [#allocation6], 0 }
   0x2   :  { %10 = vsyncpa [#allocation4], 0  ;;  %s16_s14 = sshll.u32 %s237_s0, 4  ;;  %s200_s15 = smov [#allocation2]   ;;  %s17_s14 = int_to_ptr.hbm [resolvable:$true] %s16_s14 }
   0x3   :  { %s18_s16 = sshll.u32 %s200_s15, 4  ;;  %s26_s19 = sshll.u32 %s238_s1, 4  ;;  %s19_s16 = int_to_ptr.vmem [resolvable:$true] %s18_s16  ;;  %s27_s19 = int_to_ptr.hbm [resolvable:$true] %s26_s19 }
   0x4   :  { %21 = dma.hbm_to_vmem [thread:$0]  %s17_s14, 64, %s19_s16, [#allocation3]  }
   0x5   :  { %s201_s20 = smov [#allocation5]   ;;  %s202_s22 = smov 128  }
   0x6   :  { %s28_s21 = sshll.u32 %s201_s20, 4  ;;  %s203_s23 = smov 8   ;;  %s29_s21 = int_to_ptr.vmem [resolvable:$true] %s28_s21 }
   0x7   :  { %34 = dma.hbm_to_vmem [thread:$0]  %s27_s19, 512, %s29_s21, [#allocation6], %s202_s22, %s202_s22, %s203_s23  }
   0x8   :  { %194 = dma.done.wait [#allocation3], 64  }
   0x9   :  { %195 = vsyncadd [#allocation3], 4294967232 }
   0xa   :  { %196 = dma.done.wait [#allocation6], 512  }
   0xb   :  { %197 = vsyncadd [#allocation6], 4294966784  ;;  %vm54_vm0 = vcmask 523264   ;;  %v49_v0 = vld [vmem:[#allocation5 + $0x18] sm:$0xff]  ;;  %v48_v1 = vld [vmem:[#allocation5 + $0x10] sm:$0xff]  ;;  %s204_s24 = smov [#allocation7]  }
   0xc   :  { %111 = vmatpush.xpose.msk.msra.mxu0 %vm54_vm0, %v49_v0  ;;  %v47_v2 = vld [vmem:[#allocation5 + $0x8] sm:$0xff]  ;;  %v46_v3 = vld [vmem:[#allocation5] sm:$0xff]  ;;  %v45_v4 = vld [vmem:[#allocation2] sm:$0xf]  ;;  %s98_s25 = sshll.u32 %s204_s24, 4  ;;  %s100_s28 = sshll.u32 %s240_s3, 4  ;;  %s99_s25 = int_to_ptr.vmem [resolvable:$true] %s98_s25  ;;  %s101_s28 = int_to_ptr.hbm [resolvable:$true] %s100_s28 }
   0xd   :  { %v121_v5 = vld [vmem:[%s239_s2] ss:$0 sm:$0xff]  ;;  %vm91_vm1 = vcmask 257024  }
  0x10   :  { %112 = vmatpush.xpose.msk.msra.mxu0 %vm54_vm0, %v48_v1 }
  0x14   :  { %113 = vmatpush.xpose.msk.msra.mxu0 %vm54_vm0, %v47_v2 }
  0x18   :  { %114 = vmatpush.xpose.msk.msra.mxu0 %vm54_vm0, %v46_v3 }
  0x1b   :  { %115 = vmatmul.msk.f32.vlgmr.msra.gmra.mxu0 %vm54_vm0, %v45_v4 }
  0x98   :  { %v87_v6 = vpop.f32.mrf.mxu0 }
  0x99   :  { %v88_v7 = vadd.f32 %v121_v5, %v87_v6 }
  0x9b   :  { %v90_v8 = vmax.f32 %v88_v7, 0.0 }
  0x9d   :  { %92 = vst.msk [vmem:[#allocation7] sm:$0xf] %vm91_vm1, %v90_v8 }
  0x9e   :  { %103 = dma.vmem_to_hbm [thread:$0]  %s99_s25, 64, %s101_s28, [#allocation4]  }
  0x9f   :  { %198 = dma.done.wait [#allocation4], 64  }
  0xa0   :  { %199 = vsyncadd [#allocation4], 4294967232 }
  0xa1   :  { %108 = vsyncpa [#allocation3], 1 }
  0xa2   :  { %109 = vsyncpa [#allocation6], 1 }
  0xa3   :  { %110 = vsyncpa [#allocation4], 1 }

</bundles_post_ra>
